<compile_context>
chip_gen: v7x
topology: tpu7x:2x2x1
jax: 0.10.0
libtpu: 0.0.40
codegen_flags: <defaults>
</compile_context>

<pallas_src>
import functools

import jax
import jax.numpy as jnp
from jax.experimental import pallas as pl
from jax.experimental.pallas import tpu as pltpu


def _layernorm_kernel(x_ref, g_ref, b_ref, o_ref, *, eps, inv_c):
    """LayerNorm over axis=1 (channels) of the resident block.

    Works for both block layouts used by the wrapper:
      3-D block (1, C, T)       -- C on sublanes, T on lanes
      4-D block (1, C, S, 128)  -- (S, 128) dense slabs stacked over C
    """
    x = x_ref[...].astype(jnp.float32)

    # Two-pass mean/variance: the block is already resident in VMEM, so the
    # extra sweep is free VPU/vld work for this HBM-bound kernel and avoids
    # the catastrophic cancellation of E[x^2] - mean^2.
    mean = jnp.sum(x, axis=1, keepdims=True) * inv_c
    d = x - mean
    var = jnp.sum(d * d, axis=1, keepdims=True) * inv_c          # biased var

    # One reciprocal per spatial location (stats slab), exact to match torch.
    inv = pl.reciprocal(jnp.sqrt(var) + eps, approx=False)

    g = g_ref[...].astype(jnp.float32)
    b = b_ref[...].astype(jnp.float32)
    o_ref[...] = (d * inv * g + b).astype(o_ref.dtype)


def _vmem_budget_bytes():
    """Per-generation VMEM limit with ~25% headroom (v7x: 64 MiB physical)."""
    try:
        cap = int(pltpu.get_tpu_info().vmem_capacity_bytes)
    except Exception:
        cap = 64 * 1024 * 1024          # conservative (v7x-sized) fallback
    return max(32 * 1024 * 1024, (cap * 3) // 4)


def _pick_sublane_tile(R, C, itemsize, N, block_budget):
    """Sublane tile S for the 4-D (N, C, R, 128) layout (multiple of 8 or R)."""
    per_row = C * 128 * (4 * itemsize + 16)     # 2-deep in+out bufs + f32 temps
    s_budget = max(1, block_budget // per_row)
    if R <= 8 or (s_budget >= R and N >= 8):
        return R                                # full-extent block (legal)
    S = max(8, (min(s_budget, R) // 8) * 8)
    # Keep >= ~8 total grid steps when the batch is small (megacore + pipeline).
    min_steps = -(-8 // max(1, N))
    if -(-R // S) < min_steps:
        S = max(8, ((-(-R // min_steps)) // 8) * 8)
    # Prefer an S that divides R (all stores unmasked), but never shrink >2x.
    for cand in range(S, max(7, S // 2), -8):
        if R % cand == 0:
            return cand
    return S


def _pick_lane_tile(HW, C, itemsize, N, block_budget):
    """Lane tile T for the 3-D (N, C, HW) fallback (multiple of 128 or HW)."""
    if HW <= 256:
        return HW                               # tiny spatial extent: one block
    c_pad = max(C, 8)                           # sublane padding for small C
    per_elem = c_pad * (4 * itemsize + 16)
    t_max = max(128, ((block_budget // per_elem) // 128) * 128)
    T = min(t_max, (HW // 128) * 128)
    min_steps = -(-8 // max(1, N))
    if -(-HW // T) < min_steps:
        T = max(128, ((-(-HW // min_steps)) // 128) * 128)
    return T


def layer_norm(x, g, b, eps=1e-5):
    """LayerNorm over the channel dim of an NCHW tensor (Pallas TPU)."""
    N, C, H, W = x.shape
    HW = H * W
    itemsize = jnp.dtype(x.dtype).itemsize

    vmem_limit = _vmem_budget_bytes()
    block_budget = (vmem_limit * 2) // 3

    kernel = functools.partial(_layernorm_kernel, eps=float(eps), inv_c=1.0 / C)
    cost = pl.CostEstimate(
        flops=8 * N * C * HW,
        transcendentals=2 * N * HW,
        bytes_accessed=2 * N * C * HW * itemsize + 2 * C * itemsize,
    )

    if HW % 128 == 0:
        # 4-D layout: fully packed (S, 128) slabs; channel reduce is pure VPU.
        R = HW // 128
        S = _pick_sublane_tile(R, C, itemsize, N, block_budget)
        x_r = x.reshape(N, C, R, 128)
        g_r = jnp.asarray(g).reshape(1, C, 1, 1)
        b_r = jnp.asarray(b).reshape(1, C, 1, 1)
        grid = (N, pl.cdiv(R, S))
        in_specs = [
            pl.BlockSpec((1, C, S, 128), lambda n, s: (n, 0, s, 0)),
            pl.BlockSpec((1, C, 1, 1), lambda n, s: (0, 0, 0, 0)),
            pl.BlockSpec((1, C, 1, 1), lambda n, s: (0, 0, 0, 0)),
        ]
        out_spec = pl.BlockSpec((1, C, S, 128), lambda n, s: (n, 0, s, 0))
        out_shape = jax.ShapeDtypeStruct((N, C, R, 128), x.dtype)
    else:
        # Fallback lane-dense 3-D layout (ragged spatial extents).
        T = _pick_lane_tile(HW, C, itemsize, N, block_budget)
        x_r = x.reshape(N, C, HW)
        g_r = jnp.asarray(g).reshape(1, C, 1)
        b_r = jnp.asarray(b).reshape(1, C, 1)
        grid = (N, pl.cdiv(HW, T))
        in_specs = [
            pl.BlockSpec((1, C, T), lambda n, s: (n, 0, s)),
            pl.BlockSpec((1, C, 1), lambda n, s: (0, 0, 0)),
            pl.BlockSpec((1, C, 1), lambda n, s: (0, 0, 0)),
        ]
        out_spec = pl.BlockSpec((1, C, T), lambda n, s: (n, 0, s))
        out_shape = jax.ShapeDtypeStruct((N, C, HW), x.dtype)

    out = pl.pallas_call(
        kernel,
        out_shape=out_shape,
        grid=grid,
        in_specs=in_specs,
        out_specs=out_spec,
        compiler_params=pltpu.CompilerParams(
            dimension_semantics=("parallel", "parallel"),
            vmem_limit_bytes=int(vmem_limit),
        ),
        cost_estimate=cost,
    )(x_r, g_r, b_r)

    return out.reshape(N, C, H, W)


def layer_norm_ref(x, g, b, eps=1e-5):
    # Pure-JAX reference mirroring the PyTorch forward exactly.
    xf = x.astype(jnp.float32)
    mean = jnp.mean(xf, axis=1, keepdims=True)
    var = jnp.mean(jnp.square(xf - mean), axis=1, keepdims=True)
    y = (xf - mean) / (jnp.sqrt(var) + eps) * g.astype(jnp.float32) + b.astype(jnp.float32)
    return y.astype(x.dtype)


if __name__ == "__main__":
    key = jax.random.PRNGKey(0)
    k1, k2, k3, k4, k5, k6 = jax.random.split(key, 6)

    # Case 1: module-implied shape, nontrivial affine params, nonzero mean
    # (exercises the two-pass variance and the 4-D HW%128==0 path).
    N, C, H, W = 2, 4, 16, 16
    x = jax.random.normal(k1, (N, C, H, W), jnp.float32) * 2.0 + 3.0
    g = jax.random.normal(k2, (1, C, 1, 1), jnp.float32) * 0.5 + 1.0
    b = jax.random.normal(k3, (1, C, 1, 1), jnp.float32) * 0.1
    out = jax.block_until_ready(layer_norm(x, g, b))
    ref = layer_norm_ref(x, g, b)
    assert out.shape == (N, C, H, W)
    assert jnp.allclose(out, ref, atol=2e-5, rtol=2e-5), "case1 mismatch"

    # Case 2: spatial size not a multiple of 128 (3-D fallback path).
    x2 = jax.random.normal(k4, (2, 6, 10, 10), jnp.float32) + 1.0
    g2 = jax.random.normal(k5, (1, 6, 1, 1), jnp.float32) * 0.5 + 1.0
    b2 = jnp.zeros((1, 6, 1, 1), jnp.float32)
    out2 = jax.block_until_ready(layer_norm(x2, g2, b2))
    ref2 = layer_norm_ref(x2, g2, b2)
    assert jnp.allclose(out2, ref2, atol=2e-5, rtol=2e-5), "case2 mismatch"

    # Case 3: bf16 activations, f32 params (compute stays in f32).
    x3 = (jax.random.normal(k6, (2, 8, 8, 16), jnp.float32) * 1.5 + 0.5).astype(jnp.bfloat16)
    g3 = jnp.full((1, 8, 1, 1), 1.25, jnp.float32)
    b3 = jnp.full((1, 8, 1, 1), -0.25, jnp.float32)
    out3 = jax.block_until_ready(layer_norm(x3, g3, b3))
    ref3 = layer_norm_ref(x3, g3, b3)
    assert jnp.allclose(out3.astype(jnp.float32), ref3.astype(jnp.float32),
                        atol=2e-2, rtol=2e-2), "case3 mismatch"

    print("KERNEL_OK")
</pallas_src>

<mosaic_0001>
module attributes {stable_mosaic.version = 11 : i64} {
  func.func @_layernorm_kernel(%arg0: i32, %arg1: i32, %arg2: memref<1x4x2x128xf32, #tpu.memory_space<vmem>>, %arg3: memref<1x4x1x1xf32, #tpu.memory_space<vmem>>, %arg4: memref<1x4x1x1xf32, #tpu.memory_space<vmem>>, %arg5: memref<1x4x2x128xf32, #tpu.memory_space<vmem>>) attributes {dimension_semantics = [#tpu.dimension_semantics<parallel>, #tpu.dimension_semantics<parallel>], iteration_bounds = array<i64: 2, 1>, scalar_prefetch = 0 : i64, scratch_operands = 0 : i64, tpu.core_type = #tpu.core_type<tc>, window_params = [{transform_indices = @transform_0, window_bounds = array<i64: 1, 4, 2, 128>}, {pipeline_mode = #tpu.pipeline_mode<synchronous>, transform_indices = @transform_1, window_bounds = array<i64: 1, 4, 1, 1>}, {pipeline_mode = #tpu.pipeline_mode<synchronous>, transform_indices = @transform_2, window_bounds = array<i64: 1, 4, 1, 1>}, {transform_indices = @transform_3, window_bounds = array<i64: 1, 4, 2, 128>}]} {
    %c0 = arith.constant 0 : index
    %c0_0 = arith.constant 0 : index
    %c0_1 = arith.constant 0 : index
    %c0_2 = arith.constant 0 : index
    %0 = vector.load %arg2[%c0, %c0_0, %c0_1, %c0_2] : memref<1x4x2x128xf32, #tpu.memory_space<vmem>>, vector<1x4x2x128xf32>
    %cst = arith.constant dense<0.000000e+00> : vector<1x2x128xf32>
    %1 = vector.multi_reduction <add>, %0, %cst [1] : vector<1x4x2x128xf32> to vector<1x2x128xf32>
    %2 = vector.shape_cast %1 : vector<1x2x128xf32> to vector<1x1x2x128xf32>
    %cst_3 = arith.constant 2.500000e-01 : f32
    %3 = vector.broadcast %cst_3 : f32 to vector<1x1x2x128xf32>
    %4 = arith.mulf %2, %3 : vector<1x1x2x128xf32>
    %5 = vector.broadcast %4 : vector<1x1x2x128xf32> to vector<1x4x2x128xf32>
    %6 = arith.subf %0, %5 : vector<1x4x2x128xf32>
    %7 = arith.mulf %6, %6 : vector<1x4x2x128xf32>
    %cst_4 = arith.constant dense<0.000000e+00> : vector<1x2x128xf32>
    %8 = vector.multi_reduction <add>, %7, %cst_4 [1] : vector<1x4x2x128xf32> to vector<1x2x128xf32>
    %9 = vector.shape_cast %8 : vector<1x2x128xf32> to vector<1x1x2x128xf32>
    %cst_5 = arith.constant 2.500000e-01 : f32
    %10 = vector.broadcast %cst_5 : f32 to vector<1x1x2x128xf32>
    %11 = arith.mulf %9, %10 : vector<1x1x2x128xf32>
    %12 = math.sqrt %11 : vector<1x1x2x128xf32>
    %cst_6 = arith.constant 9.99999974E-6 : f32
    %13 = vector.broadcast %cst_6 : f32 to vector<1x1x2x128xf32>
    %14 = arith.addf %12, %13 : vector<1x1x2x128xf32>
    %15 = tpu.reciprocal %14 : vector<1x1x2x128xf32> -> vector<1x1x2x128xf32>
    %c0_7 = arith.constant 0 : index
    %c0_8 = arith.constant 0 : index
    %c0_9 = arith.constant 0 : index
    %c0_10 = arith.constant 0 : index
    %16 = vector.load %arg3[%c0_7, %c0_8, %c0_9, %c0_10] : memref<1x4x1x1xf32, #tpu.memory_space<vmem>>, vector<1x4x1x1xf32>
    %c0_11 = arith.constant 0 : index
    %c0_12 = arith.constant 0 : index
    %c0_13 = arith.constant 0 : index
    %c0_14 = arith.constant 0 : index
    %17 = vector.load %arg4[%c0_11, %c0_12, %c0_13, %c0_14] : memref<1x4x1x1xf32, #tpu.memory_space<vmem>>, vector<1x4x1x1xf32>
    %18 = vector.broadcast %15 : vector<1x1x2x128xf32> to vector<1x4x2x128xf32>
    %19 = arith.mulf %6, %18 : vector<1x4x2x128xf32>
    %20 = vector.broadcast %16 : vector<1x4x1x1xf32> to vector<1x4x2x128xf32>
    %21 = arith.mulf %19, %20 : vector<1x4x2x128xf32>
    %22 = vector.broadcast %17 : vector<1x4x1x1xf32> to vector<1x4x2x128xf32>
    %23 = arith.addf %21, %22 : vector<1x4x2x128xf32>
    %c0_15 = arith.constant 0 : index
    %c0_16 = arith.constant 0 : index
    %c0_17 = arith.constant 0 : index
    %c0_18 = arith.constant 0 : index
    %24 = vector.load %arg5[%c0_15, %c0_16, %c0_17, %c0_18] : memref<1x4x2x128xf32, #tpu.memory_space<vmem>>, vector<1x4x2x128xf32>
    tpu.vector_store %arg5[%c0_15, %c0_16, %c0_17, %c0_18], %23 {strides = array<i32>} : memref<1x4x2x128xf32, #tpu.memory_space<vmem>>, vector<1x4x2x128xf32>,
    return
  }
  func.func @transform_0(%arg0: i32, %arg1: i32) -> (i32, i32, i32, i32) {
    %c0_i32 = arith.constant 0 : i32
    %c0_i32_0 = arith.constant 0 : i32
    %c0_i32_1 = arith.constant 0 : i32
    return %arg0, %c0_i32, %arg1, %c0_i32_0 : i32, i32, i32, i32
  }
  func.func @transform_1(%arg0: i32, %arg1: i32) -> (i32, i32, i32, i32) {
    %c0_i32 = arith.constant 0 : i32
    %c0_i32_0 = arith.constant 0 : i32
    %c0_i32_1 = arith.constant 0 : i32
    %c0_i32_2 = arith.constant 0 : i32
    %c0_i32_3 = arith.constant 0 : i32
    return %c0_i32, %c0_i32_0, %c0_i32_1, %c0_i32_2 : i32, i32, i32, i32
  }
  func.func @transform_2(%arg0: i32, %arg1: i32) -> (i32, i32, i32, i32) {
    %c0_i32 = arith.constant 0 : i32
    %c0_i32_0 = arith.constant 0 : i32
    %c0_i32_1 = arith.constant 0 : i32
    %c0_i32_2 = arith.constant 0 : i32
    %c0_i32_3 = arith.constant 0 : i32
    return %c0_i32, %c0_i32_0, %c0_i32_1, %c0_i32_2 : i32, i32, i32, i32
  }
  func.func @transform_3(%arg0: i32, %arg1: i32) -> (i32, i32, i32, i32) {
    %c0_i32 = arith.constant 0 : i32
    %c0_i32_0 = arith.constant 0 : i32
    %c0_i32_1 = arith.constant 0 : i32
    return %arg0, %c0_i32, %arg1, %c0_i32_0 : i32, i32, i32, i32
  }
}

</mosaic_0001>

<bundles_post_ra>
// kernel: tpu_custom_call.1
= control target key start
LH: loop header
LB: loop body
LE: loop exit
PB: predicated region body
PF: predicated region fallthrough
CT: control target
= control target key end

     0   :  { %8 = vsyncpa [#allocation3], 0  ;;  %s890_s0 = inlined_call_operand.hbm [shape: f32[2,4,2,128], index: 0, kind: input, shape index: {}]   ;;  %s891_s1 = inlined_call_operand.vmem [shape: f32[1,4,1,1], index: 1, kind: input, shape index: {}]   ;;  %s892_s2 = inlined_call_operand.vmem [shape: f32[1,4,1,1], index: 2, kind: input, shape index: {}]   ;;  %s893_s3 = inlined_call_operand.hbm [shape: f32[2,4,2,128], index: 3, kind: output, shape index: {}]  }
   0x1   :  { %10 = vsyncpa [#allocation3 + $0x1], 0 }
   0x2   :  { %11 = vsyncpa [#allocation4], 0 }
   0x3   :  { %13 = vsyncpa [#allocation4 + $0x1], 0  ;;  %s679_s12 = smov 0   ;;  %s681_s13 = smov 0  }
   0x4   :  { %s683_s14 = smov 0   ;;  %s685_s15 = smov 0  }
   0x5   :  { %s687_s16 = smov 0   ;;  %s689_s17 = smov 0  }
   0x6 LB: > { %s440_s18 = sadd.s32 4294967295, %s650_s17   ;;  %s441_s19 = sadd.s32 4294967294, %s650_s17   ;;  %s650_s17 = sphi %s689_s17, %s19_s17   ;;  %s646_s16 = sphi %s687_s16, %s908_s16   ;;  %s642_s15 = sphi %s685_s15, %s907_s15   ;;  %s638_s14 = sphi %s683_s14, %s906_s14   ;;  %s634_s13 = sphi %s681_s13, %s905_s13   ;;  %s630_s12 = sphi %s679_s12, %s904_s12  }
   0x7   : > { %s31_s20 = sadd.s32 1, %s646_s16  ;;  %s40_s21 = sadd.s32 1, %s638_s14 }
   0x8   : > { %p33_p0 = scmp.ge.s32.totalorder %s31_s20, 2  ;;  %p47_p1 = scmp.ne.s32.totalorder %s638_s14, %s634_s13 }
   0x9   : > { %p48_p2 = scmp.eq.s32.totalorder %s650_s17, 0  ;;  %p53_p3 = scmp.ne.s32.totalorder %s634_s13, %s630_s12 }
   0xa   : > { %s910_s20 = smov (%p33_p0, %s31_s20), 0  ;;  %p54_p5 = scmp.eq.s32.totalorder %s440_s18, 0 }
   0xb   : > { %p720_p4 = por %p48_p2, %p47_p1  ;;  %s35_s23 = ssub.s32 %s646_s16, %s910_s20 }
   0xc   : > { %p121_p6 = scmp.eq.s32.totalorder %s440_s18, 1  ;;  %p38_p7 = scmp.eq.s32.totalorder %s35_s23, 0 }
   0xd   : > { %p726_p8 = por %p54_p5, %p53_p3  ;;  %p127_p10 = scmp.eq.s32.totalorder %s441_s19, 1 }
   0xe   : > { %p730_p9 = por %p121_p6, %p47_p1  ;;  %p477_p13 = scmp.lt.s32.totalorder %s650_s17, 2 }
   0xf   : > { %s735_s26 = scalar_select %p38_p7, %s638_s14, %s40_s21  }
  0x10   : > { %s897_s25 = scalar_select %p730_p9, 1, 0 }
  0x11   : > { %p737_p11 = por %p127_p10, %p53_p3  ;;  %s153_s28 = sand.u32 1, %s638_s14  }
  0x12   : > { %s444_s29 = sshll.u32 %s153_s28, 3  ;;  %s463_s30 = sshll.u32 %s646_s16, 7 }
  0x13   : > { %s898_s27 = scalar_select %p737_p11, 1, 0 }
  0x14   : > { %s748_s6 = scalar_lea.hbm %s890_s0, %s463_s30  ;;  %s157_s7 = scalar_lea.vmem [#allocation2], %s444_s29 }
  0x15   : > { %s165_s8 = sshll.u32 %s157_s7, 4  ;;  %p754_p0 = pnand %p477_p13, %p720_p4  ;;  %s750_s8 = int_to_ptr.vmem [resolvable:$true] %s165_s8 }
  0x16   : > { %s759_s10 = scalar_lea.sflag [#allocation3], %s153_s28  ;;  %s538_s11 = scalar_lea.hbm %s748_s6, 128 }
  0x17   : > { %p539_p2 = scmp.ne.s32.totalorder %s748_s6, %s538_s11  ;;  %p540_p3 = pneg %p754_p0 }
  0x18   : > { %s543_s21 = scalar_lea.hbm %s890_s0, 256  ;;  %p544_p4 = scmp.lt.u32.totalorder %s748_s6, %s890_s0 }
  0x19   : > { %p541_p5 = pnand %p540_p3, %p539_p2  ;;  %p545_p7 = scmp.lt.u32.totalorder %s543_s21, %s538_s11 }
  0x1a   : > { %p547_p13 = scmp.lt.u32.totalorder %s538_s11, %s748_s6 }
  0x1b   : > { %p542_p6 = pneg %p541_p5  ;;  %p546_p10 = por %p545_p7, %p544_p4 }
  0x1d   : > { %p548_p12 = por %p547_p13, %p546_p10 }
  0x1f   : > { %p549_p1 = pnand %p548_p12, %p542_p6 }
  0x21   : > { %552 = shalt.err (!%p549_p1)
}
  0x22   : > { %s553_s28 = scalar_lea.vmem %s750_s8, 128  ;;  %s652_s29 = smov [#allocation2]  }
  0x23   : > { %p554_p2 = scmp.ne.s32.totalorder %s750_s8, %s553_s28  ;;  %s558_s30 = sshll.u32 %s652_s29, 4  ;;  %s559_s30 = int_to_ptr.vmem [resolvable:$false] %s558_s30 }
  0x24   : > { %s560_s4 = scalar_lea.vmem %s559_s30, 256  ;;  %p561_p9 = scmp.lt.s32.totalorder %s750_s8, %s559_s30 }
  0x25   : > { %p556_p5 = pnand %p554_p2, %p540_p3  ;;  %p562_p4 = scmp.lt.s32.totalorder %s560_s4, %s553_s28 }
  0x27   : > { %p557_p11 = pneg %p556_p5  ;;  %p563_p7 = por %p562_p4, %p561_p9 }
  0x29   : > { %p564_p10 = pnand %p563_p7, %p557_p11 }
  0x2b   : > { %567 = shalt.err (!%p564_p10)
}
  0x2c   : > { %s653_s5 = smov 32   ;;  %s654_s7 = smov 2  }
  0x2d   : > { %472 = dma.hbm_to_vmem [thread:$0]  (!%p754_p0), %s748_s6, 128, %s750_s8, %s759_s10, %s653_s5, %s653_s5, %s654_s7  }
  0x2e   : > { %p173_p12 = scmp.lt.s32.totalorder %s650_s17, 3  ;;  %p900_p1 = scmp.ge.s32.totalorder %s650_s17, 1 }
  0x30   : > { %p174_p3 = pnand %p900_p1, %p173_p12 }
  0x31   : > { %s791_s11 = sand.u32 (!%p174_p3), 1, %s634_s13  }
  0x32   : > { %177 = sbr.rel (%p174_p3) target bundleno = 217 (0xd9), region = 32  ;;  %s448_s18 = sshll.u32 (!%p174_p3), %s791_s11, 3 }
  0x33   : > { %s180_s19 = scalar_lea.sflag (!%p174_p3), [#allocation3], %s791_s11  ;;  %s183_s21 = scalar_lea.vmem (!%p174_p3), [#allocation2], %s448_s18 }
  0x39   : > { %621 = dma.done.wait (%p726_p8), %s180_s19, 128  }
  0x3a   : > { %623 = vsyncadd (%p726_p8), %s180_s19, 4294967168  ;;  %v655_v0 = vmov 0   ;;  %v452_v1 = vld [vmem:[%s891_s1 + $0x2] ss:$0 sm:$0xff]  ;;  %v450_v2 = vld [vmem:[%s891_s1] ss:$0 sm:$0xff] }
  0x3b   : > { %533 = vset.pattern.permute.xlu1 %v655_v0  ;;  %532 = vset.pattern.permute.xlu0 %v655_v0  ;;  %v453_v3 = vld [vmem:[%s891_s1 + $0x3] ss:$0 sm:$0xff]  ;;  %v451_v4 = vld [vmem:[%s891_s1 + $0x1] ss:$0 sm:$0xff]  ;;  %v454_v6 = vld [vmem:[%s892_s2] ss:$0 sm:$0xff] }
  0x3c   : > { %285 = vperm.xlu1 %533, %v452_v1   ;;  %277 = vperm.xlu0 %532, %v450_v2   ;;  %v455_v5 = vld [vmem:[%s892_s2 + $0x1] ss:$0 sm:$0xff]  ;;  %v457_v7 = vld [vmem:[%s892_s2 + $0x3] ss:$0 sm:$0xff]  ;;  %v456_v8 = vld [vmem:[%s892_s2 + $0x2] ss:$0 sm:$0xff] }
  0x3d   : > { %vm210_vm0 = vcmask 1041408   ;;  %v206_v9 = vld [vmem:[%s183_s21] sm:$0x3]  ;;  %v207_v10 = vld [vmem:[%s183_s21 + $0x2] sm:$0x3]  ;;  %s464_s10 = sshll.u32 %s642_s15, 7 }
  0x3e   : > { %v211_v11 = vsel %vm210_vm0, %v206_v9, 0.0  ;;  %v212_v12 = vsel %vm210_vm0, %v207_v10, 0.0  ;;  %v208_v13 = vld [vmem:[%s183_s21 + $0x4] sm:$0x3]  ;;  %v209_v16 = vld [vmem:[%s183_s21 + $0x6] sm:$0x3]  ;;  %s841_s23 = scalar_lea.hbm %s893_s3, %s464_s10 }
  0x3f   : > { %v213_v14 = vadd.f32 %v212_v12, %v211_v11  ;;  %v214_v15 = vsel %vm210_vm0, %v208_v13, 0.0  ;;  %v216_v18 = vsel %vm210_vm0, %v209_v16, 0.0  ;;  %s205_s21 = scalar_lea.vmem [#allocation5], %s448_s18  ;;  %s341_s15 = scalar_lea.sflag [#allocation4], %s791_s11 }
  0x40   : > { %289 = vperm.xlu1 %533, %v453_v3   ;;  %281 = vperm.xlu0 %532, %v451_v4   ;;  %s355_s9 = sshll.u32 %s205_s21, 4  ;;  %p901_p9 = scmp.ne.s32.totalorder %s897_s25, 0  ;;  %s836_s9 = int_to_ptr.vmem [resolvable:$true] %s355_s9 }
  0x41   : > { %v215_v17 = vadd.f32 %v214_v15, %v213_v14  ;;  %s568_s28 = scalar_lea.vmem %s836_s9, 128  ;;  %s656_s24 = smov [#allocation5]  }
  0x42   : > { %p569_p8 = scmp.ne.s32.totalorder %s836_s9, %s568_s28  ;;  %s572_s29 = sshll.u32 %s656_s24, 4  ;;  %s573_s29 = int_to_ptr.vmem [resolvable:$false] %s572_s29 }
  0x43   : > { %v217_v19 = vadd.f32 %v216_v18, %v215_v17  ;;  %s574_s30 = scalar_lea.vmem %s573_s29, 256  ;;  %p575_p6 = scmp.lt.s32.totalorder %s836_s9, %s573_s29 }
  0x44   : > { %321 = vperm.xlu1 %533, %v455_v5   ;;  %317 = vperm.xlu0 %532, %v454_v6   ;;  %p570_p11 = pnand %p569_p8, %p901_p9  ;;  %p576_p13 = scmp.lt.s32.totalorder %s574_s30, %s568_s28 }
  0x45   : > { %v218_v20 = vmul.f32 0.25, %v217_v19 }
  0x46   : > { %p571_p0 = pneg %p570_p11  ;;  %p577_p2 = por %p576_p13, %p575_p6 }
  0x47   : > { %v219_v21 = vsub.f32 %v206_v9, %v218_v20  ;;  %v220_v22 = vsub.f32 %v207_v10, %v218_v20  ;;  %v221_v23 = vsub.f32 %v208_v13, %v218_v20  ;;  %v222_v26 = vsub.f32 %v209_v16, %v218_v20 }
  0x48   : > { %329 = vperm.xlu1 %533, %v457_v7   ;;  %325 = vperm.xlu0 %532, %v456_v8   ;;  %p578_p5 = pnand %p577_p2, %p571_p0 }
  0x49   : > { %v223_v24 = vmul.f32 %v219_v21, %v219_v21  ;;  %v224_v25 = vmul.f32 %v220_v22, %v220_v22  ;;  %v225_v27 = vmul.f32 %v221_v23, %v221_v23  ;;  %v226_v31 = vmul.f32 %v222_v26, %v222_v26 }
  0x4b   : > { %v227_v28 = vsel %vm210_vm0, %v223_v24, 0.0  ;;  %v228_v29 = vsel %vm210_vm0, %v224_v25, 0.0  ;;  %v230_v32 = vsel %vm210_vm0, %v225_v27, 0.0  ;;  %v232_v34 = vsel %vm210_vm0, %v226_v31, 0.0 }
  0x4c   : > { %v229_v30 = vadd.f32 %v228_v29, %v227_v28 }
  0x4e   : > { %v231_v33 = vadd.f32 %v230_v32, %v229_v30 }
  0x50   : > { %v233_v35 = vadd.f32 %v232_v34, %v231_v33 }
  0x52   : > { %v234_v36 = vmul.f32 0.25, %v233_v35 }
  0x54   : > { %534 = vrsqrt.f32 %v234_v36  ;;  %vm237_vm1 = vcmp.eq.f32.partialorder %v234_v36, inf  ;;  %v240_v39 = vand.u32 2147483648, %v234_v36  ;;  %vm239_vm2 = vcmp.eq.f32.partialorder %v234_v36, 0.0 }
  0x5e   : > { %v535_v37 = vpop.eup %534 }
  0x5f   : > { %v236_v38 = vmul.f32 %v535_v37, %v234_v36 }
  0x61   : > { %v238_v40 = vsel %vm237_vm1, %v234_v36, %v236_v38 }
  0x62   : > { %v241_v41 = vsel %vm239_vm2, %v240_v39, %v238_v40 }
  0x63   : > { %v242_v42 = vadd.f32 1e-05, %v241_v41 }
  0x65   : > { %536 = vrcp.f32 %v242_v42 }
  0x6f   : > { %v537_v43 = vpop.eup %536 }
  0x70   : > { %v252_v46 = vmul.f32 %v537_v43, %v219_v21  ;;  %v253_v47 = vmul.f32 %v537_v43, %v220_v22  ;;  %v254_v50 = vmul.f32 %v537_v43, %v221_v23  ;;  %v255_v52 = vmul.f32 %v537_v43, %v222_v26 }
  0xbb   : > { %v286_v44 = vpop.permute.xlu1 %285  ;;  %v278_v45 = vpop.permute.xlu0 %277 }
  0xbc   : > { %v292_v51 = vmul.f32 %v278_v45, %v252_v46  ;;  %v294_v58 = vmul.f32 %v286_v44, %v254_v50 }
  0xbf   : > { %v290_v48 = vpop.permute.xlu1 %289  ;;  %v282_v49 = vpop.permute.xlu0 %281 }
  0xc0   : > { %v293_v53 = vmul.f32 %v282_v49, %v253_v47  ;;  %v295_v59 = vmul.f32 %v290_v48, %v255_v52 }
  0xc3   : > { %v322_v54 = vpop.permute.xlu1 %321  ;;  %v318_v55 = vpop.permute.xlu0 %317 }
  0xc4   : > { %v333_v56 = vadd.f32 %v322_v54, %v293_v53  ;;  %v332_v57 = vadd.f32 %v318_v55, %v292_v51 }
  0xc6   : > { %337 = vst [vmem:[%s205_s21 + $0x2] sm:$0x3] %v333_v56  ;;  %336 = vst [vmem:[%s205_s21] sm:$0x3] %v332_v57 }
  0xc7   : > { %v330_v60 = vpop.permute.xlu1 %329  ;;  %v326_v61 = vpop.permute.xlu0 %325 }
  0xc8   : > { %v335_v62 = vadd.f32 %v330_v60, %v295_v59  ;;  %v334_v63 = vadd.f32 %v326_v61, %v294_v58 }
  0xca   : > { %339 = vst [vmem:[%s205_s21 + $0x6] sm:$0x3] %v335_v62  ;;  %338 = vst [vmem:[%s205_s21 + $0x4] sm:$0x3] %v334_v63 }
  0xcb   : > { %581 = shalt.err (!%p578_p5)
}
  0xcc   : > { %s582_s4 = scalar_lea.hbm %s841_s23, 128  ;;  %s586_s19 = scalar_lea.hbm %s893_s3, 256 }
  0xcd   : > { %p583_p4 = scmp.ne.s32.totalorder %s841_s23, %s582_s4  ;;  %p587_p12 = scmp.lt.u32.totalorder %s841_s23, %s893_s3 }
  0xce   : > { %p588_p1 = scmp.lt.u32.totalorder %s586_s19, %s582_s4  ;;  %p590_p8 = scmp.lt.u32.totalorder %s582_s4, %s841_s23 }
  0xcf   : > { %p584_p7 = pnand %p583_p4, %p901_p9 }
  0xd0   : > { %p589_p3 = por %p588_p1, %p587_p12 }
  0xd1   : > { %p585_p10 = pneg %p584_p7 }
  0xd2   : > { %p591_p11 = por %p590_p8, %p589_p3 }
  0xd4   : > { %p592_p0 = pnand %p591_p11, %p585_p10 }
  0xd6   : > { %595 = shalt.err (!%p592_p0)
}
  0xd7   : > { %s657_s21 = smov 32   ;;  %s658_s10 = smov 2  }
  0xd8   : > { %467 = dma.vmem_to_hbm [thread:$0]  (%p901_p9), %s836_s9, 128, %s841_s23, %s341_s15, %s657_s21, %s657_s21, %s658_s10  }
  0xd9 PF: > { %s370_s18 = sand.u32 1, %s630_s12   ;;  %p902_p6 = scmp.ne.s32.totalorder %s898_s27, 0 }
  0xda   : > { %p903_p13 = scmp.ge.s32.totalorder %s650_s17, 2  ;;  %s371_s22 = scalar_lea.sflag [#allocation4], %s370_s18 }
  0xdc   : > { %p474_p2 = pnand %p903_p13, %p902_p6 }
  0xde   : > { %625 = dma.done.wait (!%p474_p2), %s371_s22, 128  }
  0xdf   : > { %627 = vsyncadd (!%p474_p2), %s371_s22, 4294967168  ;;  %s19_s17 = sadd.s32 1, %s650_s17   ;;  %s904_s12 = smov %s634_s13 }
  0xe0   : > { %p16_p5 = scmp.ge.s32.totalorder %s19_s17, 4   ;;  %s905_s13 = smov %s638_s14 }
  0xe1   : > { %s906_s14 = smov %s735_s26  ;;  %s907_s15 = smov %s646_s16 }
  0xe2   : > { %s908_s16 = smov %s910_s20  ;;  %18 = sbr.rel (!%p16_p5) target bundleno = 6 (0x6), region = 77 }
  0xe9   :  { %376 = vsyncpa [#allocation3], 1 }
  0xea   :  { %378 = vsyncpa [#allocation3 + $0x1], 1 }
  0xeb   :  { %379 = vsyncpa [#allocation4], 1 }
  0xec   :  { %381 = vsyncpa [#allocation4 + $0x1], 1 }

</bundles_post_ra>
